<compile_context>
chip_gen: v5e
topology: v5e:2x2
jax: 0.10.0
libtpu: 0.0.40
codegen_flags: <defaults>
</compile_context>

<pallas_src>
import jax
import jax.numpy as jnp
from jax import lax
from jax.experimental import pallas as pl
from jax.experimental.pallas import tpu as pltpu

WSO = ((-600, 1500), (100, 700), (40, 400))
_EPS = 1e-5
_LANES = 128


def _make_kernel(wh, bh, inv_hw, hw, needs_mask):
    """Per-(sample, channel) kernel with WSO constants baked in.

    wh[c], bh[c] are pre-halved so that
      sigmoid(x*w + b) == 0.5 * tanh(x*wh + bh) + 0.5   (single EUP tanh).
    """

    def kernel(x_ref, o_ref):
        # x_ref: (R, L)  one sample's flattened, lane-dense spatial slab.
        # o_ref: (1, 1, R, L)  one (sample, channel) output block.
        c = pl.program_id(1)

        # Scalar 3-way select of the window constants (sreg work, ~free).
        wh_c = jnp.where(c == 0, wh[0], jnp.where(c == 1, wh[1], wh[2]))
        bh_c = jnp.where(c == 0, bh[0], jnp.where(c == 1, bh[1], bh[2]))

        x = jnp.clip(x_ref[...].astype(jnp.float32), -2047.0, 2047.0)
        # conv1x1 + sigmoid, as a single tanh on the EUP slot.
        y = 0.5 * jnp.tanh(x * wh_c + bh_c) + 0.5

        if needs_mask:
            r, l = y.shape
            row = lax.broadcasted_iota(jnp.int32, (r, l), 0)
            lane = lax.broadcasted_iota(jnp.int32, (r, l), 1)
            valid = (row * l + lane) < hw
            ysum = jnp.sum(jnp.where(valid, y, 0.0))
        else:
            valid = None
            ysum = jnp.sum(y)

        # InstanceNorm2d(affine=False): biased variance over the real HW.
        # Two-pass (mean, then centered variance) avoids the catastrophic
        # cancellation of E[y^2] - mean^2 when the sigmoid saturates.
        mean = ysum * inv_hw
        d = y - mean
        dsq = d * d
        vsum = jnp.sum(jnp.where(valid, dsq, 0.0)) if needs_mask else jnp.sum(dsq)
        var = jnp.maximum(vsum * inv_hw, 0.0)

        o_ref[0, 0] = (d * lax.rsqrt(var + _EPS)).astype(o_ref.dtype)

    return kernel


def splitct_forward(x, wso=WSO, out_dtype=jnp.float32):
    """SplitCT forward.  x: (N, 1, H, W) float -> (N, 3, H, W) out_dtype."""
    N, C, H, W = x.shape
    assert C == 1, "SplitCT expects a single input channel"
    HW = H * W

    # Lane-dense layout: flatten the spatial dims and pad the flat length up
    # to a multiple of 128 so the 3x-amplified output path always uses
    # unmasked vector stores.
    L = _LANES
    R = pl.cdiv(HW, L)
    pad = R * L - HW
    x_flat = x.reshape(N, HW).astype(jnp.float32)
    if pad:
        x_flat = jnp.pad(x_flat, ((0, 0), (0, pad)))
    x2 = x_flat.reshape(N, R, L)

    # Compile-time window constants (the module's conv1x1 weight/bias),
    # pre-halved for the tanh form of the sigmoid.
    w = [1.0 / wso[i][1] for i in range(3)]
    b = [0.5 - wso[i][0] / wso[i][1] for i in range(3)]
    wh = tuple(float(0.5 * wi) for wi in w)
    bh = tuple(float(0.5 * bi) for bi in b)
    inv_hw = 1.0 / float(HW)

    kernel = _make_kernel(wh, bh, inv_hw, HW, needs_mask=pad > 0)

    out_bytes = jnp.dtype(out_dtype).itemsize
    # Scoped-VMEM budget: double-buffered in/out blocks + a few live f32 slab
    # temps + headroom.  (v5e's 16 MiB default is too small at >= 512^2.)
    slab = R * L * 4
    needed = 2 * slab + 2 * R * L * out_bytes + 4 * slab + (2 << 20)
    vmem_limit = int(min(max(needed, 32 << 20), 100 << 20))

    # N outer / channel inner keeps the input block index constant across the
    # 3 channel steps, so Pallas skips the x re-DMA.  For N == 1, flip which
    # axis is parallel so a v7x megacore can still split over channels.
    if N >= 2:
        dims = ("parallel", "arbitrary")
    else:
        dims = ("arbitrary", "parallel")

    cost = pl.CostEstimate(
        flops=30 * N * HW,
        transcendentals=3 * N * HW,
        bytes_accessed=(4 + 3 * out_bytes) * N * HW,
    )

    out = pl.pallas_call(
        kernel,
        out_shape=jax.ShapeDtypeStruct((N, 3, R, L), out_dtype),
        grid_spec=pltpu.PrefetchScalarGridSpec(
            num_scalar_prefetch=0,
            grid=(N, 3),
            in_specs=[
                # One sample's slab; index independent of the channel index.
                pl.BlockSpec((pl.Squeezed(), R, L), lambda n, c: (n, 0, 0)),
            ],
            out_specs=pl.BlockSpec((1, 1, R, L), lambda n, c: (n, c, 0, 0)),
        ),
        compiler_params=pltpu.CompilerParams(
            dimension_semantics=dims,
            vmem_limit_bytes=vmem_limit,
        ),
        cost_estimate=cost,
    )(x2)

    out = out.reshape(N, 3, R * L)
    if pad:
        out = out[..., :HW]
    return out.reshape(N, 3, H, W)


def _splitct_ref(x, wso=WSO):
    """Plain-JAX reference for sanity checking."""
    x = jnp.clip(x, -2047.0, 2047.0)
    w = jnp.array([1.0 / wso[i][1] for i in range(3)], jnp.float32)
    b = jnp.array([0.5 - wso[i][0] / wso[i][1] for i in range(3)], jnp.float32)
    y = x * w[None, :, None, None] + b[None, :, None, None]  # C_in=1 broadcasts
    y = jax.nn.sigmoid(y)
    mean = jnp.mean(y, axis=(2, 3), keepdims=True)
    var = jnp.mean((y - mean) ** 2, axis=(2, 3), keepdims=True)
    return (y - mean) * lax.rsqrt(var + _EPS)


if __name__ == "__main__":
    key = jax.random.PRNGKey(0)
    N, H, W = 2, 16, 16
    # Hounsfield-unit-ish values so the clamp actually bites.
    x = jax.random.normal(key, (N, 1, H, W), dtype=jnp.float32) * 1500.0

    out = jax.block_until_ready(splitct_forward(x))
    ref = _splitct_ref(x)
    assert out.shape == (N, 3, H, W)
    assert jnp.max(jnp.abs(out - ref)) < 1e-3, "mismatch vs reference"

    # Also exercise the lane-padding path (HW = 15*18 = 270, not % 128 == 0)
    # and the N == 1 dimension_semantics branch.
    x_odd = jax.random.normal(jax.random.PRNGKey(1), (1, 1, 15, 18),
                              dtype=jnp.float32) * 1500.0
    out_odd = jax.block_until_ready(splitct_forward(x_odd))
    ref_odd = _splitct_ref(x_odd)
    assert out_odd.shape == (1, 3, 15, 18)
    assert jnp.max(jnp.abs(out_odd - ref_odd)) < 1e-3, "mismatch (padded path)"

    print("KERNEL_OK")
</pallas_src>

<mosaic_0001>
module attributes {stable_mosaic.version = 11 : i64} {
  func.func @kernel(%arg0: i32, %arg1: i32, %arg2: memref<1x2x128xf32, #tpu.memory_space<vmem>>, %arg3: memref<1x1x2x128xf32, #tpu.memory_space<vmem>>) attributes {dimension_semantics = [#tpu.dimension_semantics<parallel>, #tpu.dimension_semantics<arbitrary>], iteration_bounds = array<i64: 2, 3>, scalar_prefetch = 0 : i64, scratch_operands = 0 : i64, tpu.core_type = #tpu.core_type<tc>, window_params = [{transform_indices = @transform_0, window_bounds = array<i64: 1, 2, 128>}, {transform_indices = @transform_1, window_bounds = array<i64: 1, 1, 2, 128>}]} {
    %c0_i32 = arith.constant 0 : i32
    %0 = arith.cmpi eq, %arg1, %c0_i32 : i32
    %c1_i32 = arith.constant 1 : i32
    %1 = arith.cmpi eq, %arg1, %c1_i32 : i32
    %cst = arith.constant 7.14285707E-4 : f32
    %cst_0 = arith.constant 1.250000e-03 : f32
    %2 = arith.select %1, %cst, %cst_0 : f32
    %cst_1 = arith.constant 3.3333333E-4 : f32
    %3 = arith.select %0, %cst_1, %2 : f32
    %c0_i32_2 = arith.constant 0 : i32
    %4 = arith.cmpi eq, %arg1, %c0_i32_2 : i32
    %c1_i32_3 = arith.constant 1 : i32
    %5 = arith.cmpi eq, %arg1, %c1_i32_3 : i32
    %cst_4 = arith.constant 0.178571433 : f32
    %cst_5 = arith.constant 2.000000e-01 : f32
    %6 = arith.select %5, %cst_4, %cst_5 : f32
    %cst_6 = arith.constant 4.500000e-01 : f32
    %7 = arith.select %4, %cst_6, %6 : f32
    %c0 = arith.constant 0 : index
    %c0_7 = arith.constant 0 : index
    %c0_8 = arith.constant 0 : index
    %8 = vector.load %arg2[%c0, %c0_7, %c0_8] : memref<1x2x128xf32, #tpu.memory_space<vmem>>, vector<1x2x128xf32>
    %9 = vector.shape_cast %8 : vector<1x2x128xf32> to vector<2x128xf32>
    %cst_9 = arith.constant -2.047000e+03 : f32
    %cst_10 = arith.constant 2.047000e+03 : f32
    %10 = vector.broadcast %cst_9 : f32 to vector<2x128xf32>
    %11 = arith.maximumf %10, %9 : vector<2x128xf32>
    %12 = vector.broadcast %cst_10 : f32 to vector<2x128xf32>
    %13 = arith.minimumf %12, %11 : vector<2x128xf32>
    %14 = vector.broadcast %3 : f32 to vector<2x128xf32>
    %15 = arith.mulf %13, %14 : vector<2x128xf32>
    %16 = vector.broadcast %7 : f32 to vector<2x128xf32>
    %17 = arith.addf %15, %16 : vector<2x128xf32>
    %18 = math.tanh %17 : vector<2x128xf32>
    %cst_11 = arith.constant 5.000000e-01 : f32
    %19 = vector.broadcast %cst_11 : f32 to vector<2x128xf32>
    %20 = arith.mulf %19, %18 : vector<2x128xf32>
    %cst_12 = arith.constant 5.000000e-01 : f32
    %21 = vector.broadcast %cst_12 : f32 to vector<2x128xf32>
    %22 = arith.addf %20, %21 : vector<2x128xf32>
    %23 = vector.shape_cast %22 : vector<2x128xf32> to vector<1x2x128xf32>
    %cst_13 = arith.constant dense<0.000000e+00> : vector<1xf32>
    %24 = vector.multi_reduction <add>, %23, %cst_13 [1, 2] : vector<1x2x128xf32> to vector<1xf32>
    %25 = vector.shape_cast %24 : vector<1xf32> to vector<1x1x1xf32>
    %26 = vector.extract %25[0, 0, 0] : f32 from vector<1x1x1xf32>
    %cst_14 = arith.constant 3.906250e-03 : f32
    %27 = arith.mulf %26, %cst_14 : f32
    %28 = vector.broadcast %27 : f32 to vector<2x128xf32>
    %29 = arith.subf %22, %28 : vector<2x128xf32>
    %30 = arith.mulf %29, %29 : vector<2x128xf32>
    %31 = vector.shape_cast %30 : vector<2x128xf32> to vector<1x2x128xf32>
    %cst_15 = arith.constant dense<0.000000e+00> : vector<1xf32>
    %32 = vector.multi_reduction <add>, %31, %cst_15 [1, 2] : vector<1x2x128xf32> to vector<1xf32>
    %33 = vector.shape_cast %32 : vector<1xf32> to vector<1x1x1xf32>
    %34 = vector.extract %33[0, 0, 0] : f32 from vector<1x1x1xf32>
    %cst_16 = arith.constant 3.906250e-03 : f32
    %35 = arith.mulf %34, %cst_16 : f32
    %cst_17 = arith.constant 0.000000e+00 : f32
    %36 = arith.maximumf %35, %cst_17 : f32
    %cst_18 = arith.constant 9.99999974E-6 : f32
    %37 = arith.addf %36, %cst_18 : f32
    %38 = math.rsqrt %37 : f32
    %39 = vector.broadcast %38 : f32 to vector<2x128xf32>
    %40 = arith.mulf %29, %39 : vector<2x128xf32>
    %c0_19 = arith.constant 0 : index
    %c0_20 = arith.constant 0 : index
    %c0_21 = arith.constant 0 : index
    %c0_22 = arith.constant 0 : index
    %41 = vector.load %arg3[%c0_19, %c0_20, %c0_21, %c0_22] : memref<1x1x2x128xf32, #tpu.memory_space<vmem>>, vector<1x1x2x128xf32>
    %42 = vector.shape_cast %41 : vector<1x1x2x128xf32> to vector<2x128xf32>
    %43 = vector.shape_cast %40 : vector<2x128xf32> to vector<1x1x2x128xf32>
    tpu.vector_store %arg3[%c0_19, %c0_20, %c0_21, %c0_22], %43 {strides = array<i32>} : memref<1x1x2x128xf32, #tpu.memory_space<vmem>>, vector<1x1x2x128xf32>,
    return
  }
  func.func @transform_0(%arg0: i32, %arg1: i32) -> (i32, i32, i32) {
    %c0_i32 = arith.constant 0 : i32
    %c0_i32_0 = arith.constant 0 : i32
    %c0_i32_1 = arith.constant 0 : i32
    return %arg0, %c0_i32, %c0_i32_0 : i32, i32, i32
  }
  func.func @transform_1(%arg0: i32, %arg1: i32) -> (i32, i32, i32, i32) {
    %c0_i32 = arith.constant 0 : i32
    %c0_i32_0 = arith.constant 0 : i32
    %c0_i32_1 = arith.constant 0 : i32
    return %arg0, %arg1, %c0_i32, %c0_i32_0 : i32, i32, i32, i32
  }
}

</mosaic_0001>

<bundles_post_ra>
// kernel: tpu_custom_call.1
= control target key start
LH: loop header
LB: loop body
LE: loop exit
PB: predicated region body
PF: predicated region fallthrough
CT: control target
= control target key end

     0   :  { %6 = vsyncpa [#allocation3], 0  ;;  %s771_s0 = inlined_call_operand.hbm [shape: f32[2,2,128], index: 0, kind: input, shape index: {}]   ;;  %s772_s1 = inlined_call_operand.hbm [shape: f32[2,3,2,128], index: 1, kind: output, shape index: {}]  }
   0x1   :  { %8 = vsyncpa [#allocation3 + $0x1], 0 }
   0x2   :  { %9 = vsyncpa [#allocation4], 0 }
   0x3   :  { %11 = vsyncpa [#allocation4 + $0x1], 0  ;;  %s601_s6 = smov 0   ;;  %s603_s7 = smov 0  }
   0x4   :  { %s605_s8 = smov 0   ;;  %s607_s9 = smov 0  }
   0x5   :  { %s609_s10 = smov 0   ;;  %s611_s11 = smov 0  }
   0x6   :  { %s613_s12 = smov 0   ;;  %s615_s13 = smov 0  }
   0x7   :  { %s617_s14 = smov 0   ;;  %s619_s15 = smov 0  }
   0x8   :  { %s621_s16 = smov 0  }
   0x9 LB: > { %s308_s17 = sadd.s32 4294967295, %s588_s16   ;;  %s309_s18 = sadd.s32 4294967294, %s588_s16   ;;  %s588_s16 = sphi %s621_s16, %s17_s16   ;;  %s584_s15 = sphi %s619_s15, %s792_s15   ;;  %s580_s14 = sphi %s617_s14, %s791_s14   ;;  %s576_s13 = sphi %s615_s13, %s790_s13   ;;  %s572_s12 = sphi %s613_s12, %s789_s12   ;;  %s568_s11 = sphi %s611_s11, %s788_s11   ;;  %s564_s10 = sphi %s609_s10, %s787_s10   ;;  %s560_s9 = sphi %s607_s9, %s786_s9   ;;  %s556_s8 = sphi %s605_s8, %s785_s8   ;;  %s552_s7 = sphi %s603_s7, %s784_s7   ;;  %s548_s6 = sphi %s601_s6, %s783_s6  }
   0xa   : > { %s26_s19 = sadd.s32 1, %s580_s14  ;;  %s29_s20 = sadd.s32 1, %s584_s15 }
   0xb   : > { %p27_p0 = scmp.ge.s32.totalorder %s26_s19, 3  ;;  %s36_s21 = sadd.s32 1, %s568_s11 }
   0xc   : > { %p43_p1 = scmp.ne.s32.totalorder %s568_s11, %s564_s10  ;;  %p44_p2 = scmp.eq.s32.totalorder %s588_s16, 0 }
   0xd   : > { %s794_s19 = smov (%p27_p0, %s26_s19), 0  ;;  %s796_s20 = smov (!%p27_p0, %s29_s20), %s584_s15 }
   0xe   : > { %775 = sst [smem:[#allocation8_spill]] %s794_s19  ;;  %p665_p3 = por %p44_p2, %p43_p1 }
   0xf   : > { %p49_p4 = scmp.ne.s32.totalorder %s564_s10, %s560_s9  ;;  %p31_p5 = scmp.ge.s32.totalorder %s796_s20, 2 }
  0x10   : > { %p50_p6 = scmp.eq.s32.totalorder %s308_s17, 0  ;;  %s60_s23 = ssub.s32 %s580_s14, %s794_s19 }
  0x11   : > { %s64_s24 = sadd.s32 1, %s556_s8  ;;  %s798_s20 = smov (%p31_p5, %s796_s20), 0 }
  0x12   : > { %777 = sst [smem:[#allocation9_spill]] %s798_s20  ;;  %p675_p7 = por %p50_p6, %p49_p4 }
  0x13   : > { %p74_p8 = scmp.ne.s32.totalorder %s556_s8, %s552_s7  ;;  %s33_s26 = ssub.s32 %s584_s15, %s798_s20 }
  0x14   : > { %p75_p9 = scmp.eq.s32.totalorder %s308_s17, 5  ;;  %p34_p10 = scmp.eq.s32.totalorder %s33_s26, 0 }
  0x15   : > { %s61_s27 = sor.u32 %s60_s23, %s33_s26  ;;  %p80_p13 = scmp.ne.s32.totalorder %s552_s7, %s548_s6 }
  0x16   : > { %p62_p11 = scmp.eq.s32.totalorder %s61_s27, 0  ;;  %p683_p12 = por %p75_p9, %p74_p8 }
  0x17   : > { %s688_s29 = scalar_select %p34_p10, %s568_s11, %s36_s21  }
  0x18   : > { %s691_s30 = scalar_select %p62_p11, %s556_s8, %s64_s24  }
  0x19   : > { %p81_p0 = scmp.eq.s32.totalorder %s309_s18, 5  ;;  %p341_p1 = scmp.lt.s32.totalorder %s588_s16, 6 }
  0x1a   : > { %s101_s3 = sand.u32 1, %s568_s11   ;;  %s313_s5 = sshll.u32 %s584_s15, 1 }
  0x1b   : > { %p696_p2 = por %p81_p0, %p80_p13  ;;  %s312_s4 = sshll.u32 %s101_s3, 1 }
  0x1c   : > { %s109_s23 = scalar_lea.hbm %s771_s0, %s313_s5  ;;  %s105_s21 = scalar_lea.vmem [#allocation2], %s312_s4 }
  0x1d   : > { %s113_s26 = sshll.u32 %s105_s21, 4  ;;  %s111_s27 = sshll.u32 %s109_s23, 4  ;;  %s114_s26 = int_to_ptr.vmem [resolvable:$true] %s113_s26  ;;  %s112_s27 = int_to_ptr.hbm [resolvable:$true] %s111_s27 }
  0x1e   : > { %p334_p4 = pnand %p341_p1, %p665_p3  ;;  %p314_p5 = scmp.ge.s32.totalorder %s588_s16, 1 }
  0x1f   : > { %p118_p6 = scmp.lt.s32.totalorder %s588_s16, 7  ;;  %s102_s18 = scalar_lea.sflag [#allocation3], %s101_s3 }
  0x20   : > { %336 = dma.hbm_to_vmem [thread:$0]  (!%p334_p4), %s112_s27, 32, %s114_s26, %s102_s18  }
  0x21   : > { %p119_p8 = pnand %p314_p5, %p118_p6 }
  0x22   : > { %s124_s24 = sand.u32 (!%p119_p8), 1, %s564_s10  }
  0x23   : > { %122 = sbr.rel (%p119_p8) target bundleno = 507 (0x1fb), region = 24  ;;  %s315_s20 = sshll.u32 (!%p119_p8), %s124_s24, 1 }
  0x24   : > { %s125_s19 = scalar_lea.sflag (!%p119_p8), [#allocation3], %s124_s24  ;;  %s128_s9 = scalar_lea.vmem (!%p119_p8), [#allocation2], %s315_s20 }
  0x28   : > { %539 = dma.done.wait (%p675_p7), %s125_s19, 32  }
  0x29   : > { %541 = vsyncadd (%p675_p7), %s125_s19, 4294967264  ;;  %p148_p3 = scmp.eq.s32.totalorder %s572_s12, 0  ;;  %p149_p9 = scmp.eq.s32.totalorder %s572_s12, 1  ;;  %v154_v0 = vld [vmem:[%s128_s9] sm:$0x3]  ;;  %vm164_vm0 = vcmask 1041408  }
  0x2a   : > { %v317_v2 = vclamps-f32 %v154_v0, 2047.0  ;;  %s590_s5 = smov 0.0   ;;  %s328_s21 = smul.u32 3, %s576_s13 }
  0x2b   : > { %s150_s22 = scalar_select %p149_p9, 0.0007142857, 0.00125 }
  0x2c   : > { %s152_s3 = scalar_select %p149_p9, 0.17857143, 0.2 }
  0x2d   : > { %s800_s22 = smov (%p148_p3, %s150_s22), 0.00033333333  ;;  %s145_s26 = sand.u32 1, %s552_s7  }
  0x2e   : > { %s802_s3 = smov (%p148_p3, %s152_s3), 0.45  ;;  %v157_v1 = vstv %s800_s22  ;;  %s218_s27 = sadd.s32 %s572_s12, %s328_s21 }
  0x2f   : > { %v159_v3 = vstv %s802_s3  ;;  %v158_v4 = vmul.f32 %v317_v2, %v157_v1  ;;  %s316_s18 = sshll.u32 %s145_s26, 1  ;;  %s319_s24 = sshll.u32 %s218_s27, 1 }
  0x30   : > { %s220_s3 = scalar_lea.hbm %s772_s1, %s319_s24  ;;  %s486_s21 = scalar_lea.hbm %s772_s1, 12 }
  0x31   : > { %v160_v5 = vadd.f32 %v159_v3, %v158_v4 }
  0x33   : > { %432 = vtanh.f32 %v160_v5 }
  0x39   : > { %v433_v6 = vpop.eup %432 }
  0x3a   : > { %v162_v7 = vmul.f32 0.5, %v433_v6 }
  0x3c   : > { %v163_v8 = vadd.f32 0.5, %v162_v7 }
  0x3e   : > { %v165_v9 = vsel %vm164_vm0, %v163_v8, 0.0 }
  0x3f   : > { %166 = vadd.xlane.f32.xlu0 %v165_v9 }
  0xb2   : > { %v167_v10 = vpop.xlane.xlu0 %166 }
  0xb3   : > { %v168_v11 = vrot.slane %v167_v10, 4 }
  0xb5   : > { %v169_v12 = vadd.f32 %v168_v11, %v167_v10 }
  0xb7   : > { %v170_v13 = vrot.slane %v169_v12, 2 }
  0xb9   : > { %v171_v14 = vadd.f32 %v170_v13, %v169_v12 }
  0xbb   : > { %v172_v15 = vrot.slane %v171_v14, 1 }
  0xbd   : > { %v173_v16 = vadd.f32 %v172_v15, %v171_v14 }
  0xbf   : > { %322 = vpush %v173_v16 }
  0xf0   : > { %s323_s19 = spop %322 }
  0xf1   : > { %s175_s20 = smul.f32 0.00390625, %s323_s19  ;;  %s147_s19 = scalar_lea.vmem [#allocation5], %s316_s18 }
  0xf3   : > { %v176_v17 = vstv %s175_s20  ;;  %s222_s20 = sshll.u32 %s147_s19, 4  ;;  %s223_s20 = int_to_ptr.vmem [resolvable:$true] %s222_s20 }
  0xf4   : > { %v177_v18 = vsub.f32 %v163_v8, %v176_v17 }
  0xf6   : > { %v178_v19 = vmul.f32 %v177_v18, %v177_v18 }
  0xf8   : > { %v179_v20 = vsel %vm164_vm0, %v178_v19, 0.0 }
  0xf9   : > { %180 = vadd.xlane.f32.xlu0 %v179_v20 }
 0x16c   : > { %v181_v21 = vpop.xlane.xlu0 %180 }
 0x16d   : > { %v182_v22 = vrot.slane %v181_v21, 4 }
 0x16f   : > { %v183_v23 = vadd.f32 %v182_v22, %v181_v21 }
 0x171   : > { %v184_v24 = vrot.slane %v183_v23, 2 }
 0x173   : > { %v185_v25 = vadd.f32 %v184_v24, %v183_v23 }
 0x175   : > { %v186_v26 = vrot.slane %v185_v25, 1 }
 0x177   : > { %v187_v27 = vadd.f32 %v186_v26, %v185_v25 }
 0x179   : > { %324 = vpush %v187_v27 }
 0x1aa   : > { %s325_s25 = spop %324 }
 0x1ab   : > { %s189_s4 = smul.f32 0.00390625, %s325_s25  ;;  %s224_s25 = sshll.u32 %s220_s3, 4  ;;  %s225_s25 = int_to_ptr.hbm [resolvable:$true] %s224_s25 }
 0x1ac   : > { %s480_s13 = sshra.s32 %s225_s25, 4  ;;  %s481_s13 = int_to_ptr.hbm [resolvable:$true] %s480_s13 }
 0x1ad   : > { %s190_s17 = smax.f32 %s590_s5, %s189_s4  ;;  %s208_s5 = scalar_lea.sflag [#allocation4], %s145_s26 }
 0x1ae   : > { %s191_s23 = sadd.f32 1e-05, %s190_s17  ;;  %s482_s12 = scalar_lea.hbm %s481_s13, 2 }
 0x1af   : > { %p483_p7 = scmp.ne.s32.totalorder %s481_s13, %s482_s12  ;;  %p487_p13 = scmp.lt.s32.totalorder %s481_s13, %s772_s1 }
 0x1b0   : > { %v192_v28 = vstv %s191_s23  ;;  %p488_p0 = scmp.lt.s32.totalorder %s486_s21, %s482_s12 }
 0x1b1   : > { %434 = vrsqrt.f32 %v192_v28  ;;  %vm199_vm2 = vweird.f32 %v192_v28  ;;  %p484_p10 = pnand %p483_p7, %p683_p12 }
 0x1b2   : > { %p489_p1 = por %p488_p0, %p487_p13 }
 0x1b3   : > { %p485_p11 = pneg %p484_p10 }
 0x1b5   : > { %p490_p4 = pnand %p489_p1, %p485_p11 }
 0x1b7   : > { %v435_v29 = vpop.eup %434 }
 0x1b8   : > { %v194_v30 = vmul.f32 %v435_v29, %v192_v28  ;;  %vm200_vm1 = vweird.f32 %v435_v29 }
 0x1b9   : > { %vm201_vm3 = vmor %vm199_vm2, %vm200_vm1 }
 0x1ba   : > { %v195_v31 = vmul.f32 %v435_v29, %v194_v30 }
 0x1bc   : > { %v196_v32 = vmul.f32 0.5, %v195_v31 }
 0x1be   : > { %v197_v33 = vsub.f32 1.5, %v196_v32 }
 0x1c0   : > { %v198_v34 = vmul.f32 %v435_v29, %v197_v33 }
 0x1c2   : > { %v202_v35 = vsel %vm201_vm3, %v435_v29, %v198_v34 }
 0x1c3   : > { %326 = vpush %v202_v35 }
 0x1f4   : > { %s327_s4 = spop %326 }
 0x1f5   : > { %v204_v36 = vstv %s327_s4 }
 0x1f6   : > { %v205_v37 = vmul.f32 %v204_v36, %v177_v18 }
 0x1f8   : > { %206 = vst [vmem:[%s147_s19] sm:$0x3] %v205_v37 }
 0x1f9   : > { %493 = shalt.err (!%p490_p4)
}
 0x1fa   : > { %331 = dma.vmem_to_hbm [thread:$0]  (%p683_p12), %s223_s20, 32, %s225_s25, %s208_s5  }
 0x1fb PF: > { %p342_p5 = scmp.ge.s32.totalorder %s588_s16, 2  ;;  %s236_s26 = sand.u32 1, %s548_s6  }
 0x1fc   : > { %s237_s24 = scalar_lea.sflag [#allocation4], %s236_s26 }
 0x1fd   : > { %p338_p6 = pnand %p342_p5, %p696_p2 }
 0x1ff   : > { %p339_p8 = pneg %p338_p6 }
 0x201   : > { %543 = dma.done.wait (%p339_p8), %s237_s24, 32  }
 0x202   : > { %545 = vsyncadd (%p339_p8), %s237_s24, 4294967264  ;;  %s17_s16 = sadd.s32 1, %s588_s16   ;;  %s781_s28 = sld [smem:[#allocation8_spill]] }
 0x203   : > { %p14_p3 = scmp.ge.s32.totalorder %s17_s16, 8   ;;  %s782_s22 = sld [smem:[#allocation9_spill]] }
 0x204   : > { %s783_s6 = smov %s552_s7  ;;  %s784_s7 = smov %s556_s8 }
 0x205   : > { %s785_s8 = smov %s691_s30  ;;  %s786_s9 = smov %s564_s10 }
 0x206   : > { %s787_s10 = smov %s568_s11  ;;  %s788_s11 = smov %s688_s29 }
 0x207   : > { %s789_s12 = smov %s580_s14  ;;  %s790_s13 = smov %s584_s15 }
 0x208   : > { %s791_s14 = smov %s781_s28  ;;  %16 = sbr.rel (!%p14_p3) target bundleno = 9 (0x9), region = 69 }
 0x209   : > { %s792_s15 = smov %s782_s22 }
 0x20d   :  { %243 = vsyncpa [#allocation3], 1 }
 0x20e   :  { %245 = vsyncpa [#allocation3 + $0x1], 1 }
 0x20f   :  { %246 = vsyncpa [#allocation4], 1 }
 0x210   :  { %248 = vsyncpa [#allocation4 + $0x1], 1 }

</bundles_post_ra>
